<compile_context>
chip_gen: v7x
topology: tpu7x:2x2x1
jax: 0.10.0
libtpu: 0.0.40
codegen_flags: <defaults>
</compile_context>

<pallas_src>
import functools
import math

import jax
import jax.numpy as jnp
from jax.experimental import pallas as pl
from jax.experimental.pallas import tpu as pltpu

# ---------------- model dims (small, consistent with the module) ----------------
SEQ = 8
BATCH = 2
HIDDEN = 32
NUM_HEADS = 4
HEAD_DIM = HIDDEN // NUM_HEADS          # kv_channels = 8
PROJ = NUM_HEADS * HEAD_DIM             # projection_size = 32
FFN = 64                                # ffn_hidden_size
EPS = 1e-5
DTYPE = jnp.float32                     # I/O + elementwise math
MXU_DTYPE = jnp.bfloat16                # matmul operand dtype (f32 accumulation)


# ================================ fused Pallas kernel ================================

def _glm_block_kernel(x_ref, ln1_w_ref, ln2_w_ref, qkv_wt_ref, dense_wt_ref,
                      h4_wt_ref, h4h_wt_ref, cos_ref, sin_ref,
                      out_ref, kcache_ref, vcache_ref,
                      *, eps, seq, nheads, hd, proj, ffn):
    # One grid step == one batch element; rows of every 2-D block are seq positions.
    x = x_ref[...].astype(jnp.float32)                                   # [S, H]

    def rmsnorm(t, w):
        var = jnp.mean(t * t, axis=-1, keepdims=True)
        return (t * jax.lax.rsqrt(var + eps)) * w

    # ---- input RMSNorm ----
    ln1 = rmsnorm(x, ln1_w_ref[...])

    # ---- fused QKV projection (bf16 operands, f32 accumulate).
    #      qkv_wt columns = [Q | K | V]; softmax scale already folded into Q cols.
    mixed = jnp.dot(ln1.astype(MXU_DTYPE), qkv_wt_ref[...],
                    preferred_element_type=jnp.float32)                  # [S, 3P]
    q = mixed[:, :proj]
    k = mixed[:, proj:2 * proj]
    v = mixed[:, 2 * proj:]

    # ---- RoPE: interleaved-pair rotation = x*cos + pair_swap(x)*sin_signed.
    #      pair_swap is a lane roll + even/odd select (no MXU permutation matmul).
    cos = cos_ref[...]                                                   # [S, P]
    sin = sin_ref[...]                                                   # [S, P] (signed, 0 on pass-through dims)
    lane = jax.lax.broadcasted_iota(jnp.int32, (seq, proj), 1)
    even = (lane & 1) == 0

    def rope(t):
        pair = jnp.where(even, jnp.roll(t, -1, axis=1), jnp.roll(t, 1, axis=1))
        return t * cos + pair * sin

    q = rope(q)
    k = rope(k)

    # ---- kv cache: single lane-dense [S, P] store per tensor (rope'd k, raw v) ----
    kcache_ref[...] = k.astype(kcache_ref.dtype)
    vcache_ref[...] = v.astype(vcache_ref.dtype)

    # ---- causal attention: one batched dot per stage over all heads ----
    def to_heads(t):                                                     # [S, P] -> [nh, S, hd]
        return jnp.stack([t[:, h_ * hd:(h_ + 1) * hd] for h_ in range(nheads)], axis=0)

    q3 = to_heads(q).astype(MXU_DTYPE)
    k3 = to_heads(k).astype(MXU_DTYPE)
    v3 = to_heads(v).astype(MXU_DTYPE)

    scores = jnp.einsum('hqd,hkd->hqk', q3, k3,
                        preferred_element_type=jnp.float32)              # [nh, S, S]
    rowi = jax.lax.broadcasted_iota(jnp.int32, (nheads, seq, seq), 1)
    coli = jax.lax.broadcasted_iota(jnp.int32, (nheads, seq, seq), 2)
    scores = jnp.where(rowi >= coli, scores, -1e30)
    scores = scores - jnp.max(scores, axis=-1, keepdims=True)
    p = jnp.exp(scores)
    p = p * pl.reciprocal(jnp.sum(p, axis=-1, keepdims=True), approx=True)

    ctx3 = jnp.einsum('hqk,hkd->hqd', p.astype(MXU_DTYPE), v3,
                      preferred_element_type=jnp.float32)                # [nh, S, hd]
    # reassemble heads along lanes (no scratch round-trip)
    ctx = jnp.concatenate([ctx3[h_] for h_ in range(nheads)], axis=-1)   # [S, P]

    # ---- attention output projection + residual #1 (dropout = identity) ----
    attn_out = jnp.dot(ctx.astype(MXU_DTYPE), dense_wt_ref[...],
                       preferred_element_type=jnp.float32)               # [S, H]
    resid1 = x + attn_out

    # ---- post-attention RMSNorm + SwiGLU MLP + residual #2 ----
    ln2 = rmsnorm(resid1, ln2_w_ref[...])
    h4 = jnp.dot(ln2.astype(MXU_DTYPE), h4_wt_ref[...],
                 preferred_element_type=jnp.float32)                     # [S, 2F]
    a = h4[:, :ffn]
    g = h4[:, ffn:]
    act = a * jax.nn.sigmoid(a) * g                                      # silu(a) * g, f32
    mlp_out = jnp.dot(act.astype(MXU_DTYPE), h4h_wt_ref[...],
                      preferred_element_type=jnp.float32)                # [S, H]
    out_ref[...] = (resid1 + mlp_out).astype(out_ref.dtype)


@jax.jit
def glm_block_forward(prep, hidden_states):
    """Matches GLMBlock.forward (eval mode). Returns (output, kv_cache, reg_loss)."""
    s, b, h = hidden_states.shape
    # [s, b, h] -> [b, s, h] -> [b*s, h]: batch-major rows so each grid step owns
    # one contiguous [s, h] row block.
    x2d = jnp.transpose(hidden_states, (1, 0, 2)).reshape(b * s, h)

    kernel = functools.partial(_glm_block_kernel, eps=EPS, seq=s, nheads=NUM_HEADS,
                               hd=HEAD_DIM, proj=PROJ, ffn=FFN)
    const = lambda i: (0, 0)   # weight / table blocks: fetched once, VMEM-resident

    out2d, kc2d, vc2d = pl.pallas_call(
        kernel,
        out_shape=(jax.ShapeDtypeStruct((b * s, h), hidden_states.dtype),
                   jax.ShapeDtypeStruct((b * s, PROJ), hidden_states.dtype),
                   jax.ShapeDtypeStruct((b * s, PROJ), hidden_states.dtype)),
        grid=(b,),
        in_specs=[pl.BlockSpec((s, h), lambda i: (i, 0)),
                  pl.BlockSpec((1, h), const),
                  pl.BlockSpec((1, h), const),
                  pl.BlockSpec((h, 3 * PROJ), const),
                  pl.BlockSpec((PROJ, h), const),
                  pl.BlockSpec((h, 2 * FFN), const),
                  pl.BlockSpec((FFN, h), const),
                  pl.BlockSpec((s, PROJ), const),
                  pl.BlockSpec((s, PROJ), const)],
        out_specs=(pl.BlockSpec((s, h), lambda i: (i, 0)),
                   pl.BlockSpec((s, PROJ), lambda i: (i, 0)),
                   pl.BlockSpec((s, PROJ), lambda i: (i, 0))),
        compiler_params=pltpu.CompilerParams(dimension_semantics=("parallel",)),
    )(x2d, prep["input_ln_w"], prep["post_ln_w"], prep["qkv_wt"], prep["dense_wt"],
      prep["h_to_4h_wt"], prep["4h_to_h_wt"], prep["rope_cos"], prep["rope_sin"])

    output = jnp.transpose(out2d.reshape(b, s, h), (1, 0, 2))            # back to [s, b, h]
    # lane-dense slabs -> module's SDPA kv_cache layout [b, nh, s, hd] (wrapper-side plumbing)
    k_cache = jnp.transpose(kc2d.reshape(b, s, NUM_HEADS, HEAD_DIM), (0, 2, 1, 3))
    v_cache = jnp.transpose(vc2d.reshape(b, s, NUM_HEADS, HEAD_DIM), (0, 2, 1, 3))
    return output, (k_cache, v_cache), None


# =========================== one-time weight / table preparation ===========================

def build_rope_cache(seq_len, head_dim, base=10000.0, dtype=DTYPE):
    rot_dim = head_dim // 2
    theta = 1.0 / (base ** (jnp.arange(0, rot_dim, 2, dtype=jnp.float32) / rot_dim))
    idx = jnp.arange(seq_len, dtype=jnp.float32)
    freqs = jnp.outer(idx, theta)                                         # [seq, rot//2]
    return jnp.stack([jnp.cos(freqs), jnp.sin(freqs)], axis=-1).astype(dtype)


def prepare_block(params, rope_cache, seq):
    """Pre-permute / pre-transpose / pre-scale weights and precompute RoPE tables (once)."""
    h = HIDDEN
    # qkv_w rows are [head, (q|k|v), d]; regroup to [part, head, d] and transpose to [in, out].
    w_qkv = params["qkv_w"].reshape(NUM_HEADS, 3, HEAD_DIM, h)
    w_qkv = jnp.transpose(w_qkv, (1, 0, 2, 3)).reshape(3 * PROJ, h)
    qkv_wt = jnp.transpose(w_qkv)                                         # [H, 3P], cols=[Q|K|V]
    # fold 1/sqrt(head_dim) softmax scale into the Q columns (RoPE is linear -> exact)
    qkv_wt = qkv_wt.at[:, :PROJ].multiply(1.0 / math.sqrt(HEAD_DIM))
    dense_wt = jnp.transpose(params["dense_w"])                           # [P, H]
    h4_wt = jnp.transpose(params["w_h_to_4h"])                            # [H, 2F]
    h4h_wt = jnp.transpose(params["w_4h_to_h"])                           # [F, H]

    rot = rope_cache.shape[-2] * 2                                        # rotated dims per head
    cos = jnp.repeat(rope_cache[..., 0], 2, axis=-1)                      # [seq, rot]
    sin = jnp.repeat(rope_cache[..., 1], 2, axis=-1)                      # [seq, rot]
    sign = jnp.tile(jnp.array([-1.0, 1.0], DTYPE), rot // 2)              # [-s, +s, ...]
    cos_head = jnp.concatenate([cos, jnp.ones((seq, HEAD_DIM - rot), DTYPE)], axis=-1)
    sin_head = jnp.concatenate([sin * sign, jnp.zeros((seq, HEAD_DIM - rot), DTYPE)], axis=-1)
    rope_cos = jnp.tile(cos_head, (1, NUM_HEADS))                         # [seq, P]
    rope_sin = jnp.tile(sin_head, (1, NUM_HEADS))                         # [seq, P]

    return {
        "input_ln_w": params["input_ln_w"].reshape(1, h).astype(DTYPE),
        "post_ln_w": params["post_ln_w"].reshape(1, h).astype(DTYPE),
        "qkv_wt": qkv_wt.astype(MXU_DTYPE),
        "dense_wt": dense_wt.astype(MXU_DTYPE),
        "h_to_4h_wt": h4_wt.astype(MXU_DTYPE),
        "4h_to_h_wt": h4h_wt.astype(MXU_DTYPE),
        "rope_cos": rope_cos.astype(DTYPE),
        "rope_sin": rope_sin.astype(DTYPE),
    }


def init_params(key):
    k1, k2, k3, k4 = jax.random.split(key, 4)
    scale = 0.02
    return {
        "input_ln_w": jnp.ones((HIDDEN,), DTYPE),
        "post_ln_w": jnp.ones((HIDDEN,), DTYPE),
        # PyTorch nn.Linear weight layout: [out_features, in_features]
        "qkv_w": (jax.random.normal(k1, (3 * PROJ, HIDDEN)) * scale).astype(DTYPE),
        "dense_w": (jax.random.normal(k2, (HIDDEN, PROJ)) * scale).astype(DTYPE),
        "w_h_to_4h": (jax.random.normal(k3, (2 * FFN, HIDDEN)) * scale).astype(DTYPE),
        "w_4h_to_h": (jax.random.normal(k4, (HIDDEN, FFN)) * scale).astype(DTYPE),
    }


# =========================== pure-JAX reference (for verification) ===========================

def apply_rotary_pos_emb_ref(x, rope_cache):
    sq, b, np_, hn = x.shape
    rot_dim = rope_cache.shape[-2] * 2
    x_rot, x_pass = x[..., :rot_dim], x[..., rot_dim:]
    rope = rope_cache[:sq].reshape(sq, 1, 1, rot_dim // 2, 2)
    xshaped = x_rot.reshape(sq, b, np_, rot_dim // 2, 2)
    x0, x1 = xshaped[..., 0], xshaped[..., 1]
    r0, r1 = rope[..., 0], rope[..., 1]
    out = jnp.stack([x0 * r0 - x1 * r1, x1 * r0 + x0 * r1], axis=-1)
    return jnp.concatenate([out.reshape(sq, b, np_, rot_dim), x_pass], axis=-1)


def glm_block_reference(params, hidden_states, rope_cache):
    s, b, h = hidden_states.shape
    x2d = hidden_states.reshape(s * b, h)

    def rms(x, w):
        xf = x.astype(jnp.float32)
        var = jnp.mean(xf * xf, axis=-1, keepdims=True)
        return (w * (xf * jax.lax.rsqrt(var + EPS))).astype(x.dtype)

    ln1 = rms(x2d, params["input_ln_w"])
    mixed = (ln1 @ params["qkv_w"].T).reshape(s, b, NUM_HEADS, 3 * HEAD_DIM)
    q, k, v = jnp.split(mixed, 3, axis=-1)
    q = apply_rotary_pos_emb_ref(q, rope_cache)
    k = apply_rotary_pos_emb_ref(k, rope_cache)
    qb, kb, vb = [jnp.transpose(t, (1, 2, 0, 3)) for t in (q, k, v)]
    scores = jnp.einsum('bhqd,bhkd->bhqk', qb, kb) / math.sqrt(HEAD_DIM)
    mask = jnp.tril(jnp.ones((s, s), bool))
    scores = jnp.where(mask, scores, -jnp.inf)
    p = jax.nn.softmax(scores, axis=-1)
    ctx = jnp.einsum('bhqk,bhkd->bhqd', p, vb)
    ctx = jnp.transpose(ctx, (2, 0, 1, 3)).reshape(s * b, PROJ)
    attn_out = ctx @ params["dense_w"].T
    resid1 = x2d + attn_out
    ln2 = rms(resid1, params["post_ln_w"])
    h4 = ln2 @ params["w_h_to_4h"].T
    a, g = jnp.split(h4, 2, axis=-1)
    mlp = (jax.nn.silu(a) * g) @ params["w_4h_to_h"].T
    return (resid1 + mlp).reshape(s, b, h), (kb, vb)


if __name__ == "__main__":
    root = jax.random.PRNGKey(0)
    k_param, k_x = jax.random.split(root)

    params = init_params(k_param)
    hidden_states = jax.random.normal(k_x, (SEQ, BATCH, HIDDEN)).astype(DTYPE)
    rope_cache = build_rope_cache(SEQ, HEAD_DIM)                      # [SEQ, HEAD_DIM//4, 2]

    prep = prepare_block(params, rope_cache, SEQ)                     # one-time weight prep
    out, kv_cache, reg_loss = glm_block_forward(prep, hidden_states)
    out = jax.block_until_ready(out)
    jax.block_until_ready(kv_cache)

    # shape / sanity / numerical checks against a pure-JAX f32 reference of the same math
    ref_out, (ref_k, ref_v) = glm_block_reference(params, hidden_states, rope_cache)
    assert out.shape == (SEQ, BATCH, HIDDEN)
    assert kv_cache[0].shape == (BATCH, NUM_HEADS, SEQ, HEAD_DIM)
    assert bool(jnp.all(jnp.isfinite(out)))
    assert bool(jnp.allclose(out, ref_out, atol=1e-2, rtol=1e-2))
    assert bool(jnp.allclose(kv_cache[0], ref_k, atol=1e-2, rtol=1e-2))
    assert bool(jnp.allclose(kv_cache[1], ref_v, atol=1e-2, rtol=1e-2))
    print("KERNEL_OK")
</pallas_src>

<mosaic_0001>
module attributes {stable_mosaic.version = 11 : i64} {
  func.func @_glm_block_kernel(%arg0: i32, %arg1: memref<8x32xf32, #tpu.memory_space<vmem>>, %arg2: memref<1x32xf32, #tpu.memory_space<vmem>>, %arg3: memref<1x32xf32, #tpu.memory_space<vmem>>, %arg4: memref<32x96xbf16, #tpu.memory_space<vmem>>, %arg5: memref<32x32xbf16, #tpu.memory_space<vmem>>, %arg6: memref<32x128xbf16, #tpu.memory_space<vmem>>, %arg7: memref<64x32xbf16, #tpu.memory_space<vmem>>, %arg8: memref<8x32xf32, #tpu.memory_space<vmem>>, %arg9: memref<8x32xf32, #tpu.memory_space<vmem>>, %arg10: memref<8x32xf32, #tpu.memory_space<vmem>>, %arg11: memref<8x32xf32, #tpu.memory_space<vmem>>, %arg12: memref<8x32xf32, #tpu.memory_space<vmem>>) attributes {dimension_semantics = [#tpu.dimension_semantics<parallel>], iteration_bounds = array<i64: 2>, scalar_prefetch = 0 : i64, scratch_operands = 0 : i64, tpu.core_type = #tpu.core_type<tc>, window_params = [{transform_indices = @transform_0, window_bounds = array<i64: 8, 32>}, {pipeline_mode = #tpu.pipeline_mode<synchronous>, transform_indices = @transform_1, window_bounds = array<i64: 1, 32>}, {pipeline_mode = #tpu.pipeline_mode<synchronous>, transform_indices = @transform_2, window_bounds = array<i64: 1, 32>}, {pipeline_mode = #tpu.pipeline_mode<synchronous>, transform_indices = @transform_3, window_bounds = array<i64: 32, 96>}, {pipeline_mode = #tpu.pipeline_mode<synchronous>, transform_indices = @transform_4, window_bounds = array<i64: 32, 32>}, {pipeline_mode = #tpu.pipeline_mode<synchronous>, transform_indices = @transform_5, window_bounds = array<i64: 32, 128>}, {pipeline_mode = #tpu.pipeline_mode<synchronous>, transform_indices = @transform_6, window_bounds = array<i64: 64, 32>}, {pipeline_mode = #tpu.pipeline_mode<synchronous>, transform_indices = @transform_7, window_bounds = array<i64: 8, 32>}, {pipeline_mode = #tpu.pipeline_mode<synchronous>, transform_indices = @transform_8, window_bounds = array<i64: 8, 32>}, {transform_indices = @transform_9, window_bounds = array<i64: 8, 32>}, {transform_indices = @transform_10, window_bounds = array<i64: 8, 32>}, {transform_indices = @transform_11, window_bounds = array<i64: 8, 32>}]} {
    %c0 = arith.constant 0 : index
    %c0_0 = arith.constant 0 : index
    %0 = vector.load %arg1[%c0, %c0_0] : memref<8x32xf32, #tpu.memory_space<vmem>>, vector<8x32xf32>
    %c0_1 = arith.constant 0 : index
    %c0_2 = arith.constant 0 : index
    %1 = vector.load %arg2[%c0_1, %c0_2] : memref<1x32xf32, #tpu.memory_space<vmem>>, vector<1x32xf32>
    %2 = arith.mulf %0, %0 : vector<8x32xf32>
    %cst = arith.constant dense<0.000000e+00> : vector<8xf32>
    %3 = vector.multi_reduction <add>, %2, %cst [1] : vector<8x32xf32> to vector<8xf32>
    %4 = vector.shape_cast %3 : vector<8xf32> to vector<8x1xf32>
    %cst_3 = arith.constant 3.200000e+01 : f32
    %5 = vector.broadcast %cst_3 : f32 to vector<8x1xf32>
    %6 = arith.divf %4, %5 : vector<8x1xf32>
    %cst_4 = arith.constant 9.99999974E-6 : f32
    %7 = vector.broadcast %cst_4 : f32 to vector<8x1xf32>
    %8 = arith.addf %6, %7 : vector<8x1xf32>
    %9 = math.rsqrt %8 : vector<8x1xf32>
    %10 = vector.broadcast %9 : vector<8x1xf32> to vector<8x32xf32>
    %11 = arith.mulf %0, %10 : vector<8x32xf32>
    %12 = vector.broadcast %1 : vector<1x32xf32> to vector<8x32xf32>
    %13 = arith.mulf %11, %12 : vector<8x32xf32>
    %14 = arith.truncf %13 : vector<8x32xf32> to vector<8x32xbf16>
    %c0_5 = arith.constant 0 : index
    %c0_6 = arith.constant 0 : index
    %15 = vector.load %arg4[%c0_5, %c0_6] : memref<32x96xbf16, #tpu.memory_space<vmem>>, vector<32x96xbf16>
    %cst_7 = arith.constant dense<0.000000e+00> : vector<8x96xf32>
    %16 = tpu.matmul %14, %15, %cst_7 {dimension_numbers = #tpu.dot_dimension_numbers<[1], [0], [0], [1], [0, 0, 1, 1], [], []>} : vector<8x32xbf16>, vector<32x96xbf16>, vector<8x96xf32> -> vector<8x96xf32>
    %17 = vector.extract_strided_slice %16 {offsets = [0, 0], sizes = [8, 32], strides = [1, 1]} : vector<8x96xf32> to vector<8x32xf32>
    %18 = vector.extract_strided_slice %16 {offsets = [0, 32], sizes = [8, 32], strides = [1, 1]} : vector<8x96xf32> to vector<8x32xf32>
    %19 = vector.extract_strided_slice %16 {offsets = [0, 64], sizes = [8, 32], strides = [1, 1]} : vector<8x96xf32> to vector<8x32xf32>
    %c0_8 = arith.constant 0 : index
    %c0_9 = arith.constant 0 : index
    %20 = vector.load %arg8[%c0_8, %c0_9] : memref<8x32xf32, #tpu.memory_space<vmem>>, vector<8x32xf32>
    %c0_10 = arith.constant 0 : index
    %c0_11 = arith.constant 0 : index
    %21 = vector.load %arg9[%c0_10, %c0_11] : memref<8x32xf32, #tpu.memory_space<vmem>>, vector<8x32xf32>
    %22 = tpu.iota {dimensions = array<i32: 1>} : vector<8x32xi32>
    %c1_i32 = arith.constant 1 : i32
    %23 = vector.broadcast %c1_i32 : i32 to vector<8x32xi32>
    %24 = arith.andi %22, %23 : vector<8x32xi32>
    %c0_i32 = arith.constant 0 : i32
    %25 = vector.broadcast %c0_i32 : i32 to vector<8x32xi32>
    %26 = arith.cmpi eq, %24, %25 : vector<8x32xi32>
    %27 = vector.extract_strided_slice %17 {offsets = [0, 1], sizes = [8, 31], strides = [1, 1]} : vector<8x32xf32> to vector<8x31xf32>
    %28 = vector.extract_strided_slice %17 {offsets = [0, 0], sizes = [8, 1], strides = [1, 1]} : vector<8x32xf32> to vector<8x1xf32>
    %29 = tpu.concatenate %27, %28 in 1 : vector<8x31xf32>, vector<8x1xf32> -> vector<8x32xf32>
    %30 = vector.extract_strided_slice %17 {offsets = [0, 31], sizes = [8, 1], strides = [1, 1]} : vector<8x32xf32> to vector<8x1xf32>
    %31 = vector.extract_strided_slice %17 {offsets = [0, 0], sizes = [8, 31], strides = [1, 1]} : vector<8x32xf32> to vector<8x31xf32>
    %32 = tpu.concatenate %30, %31 in 1 : vector<8x1xf32>, vector<8x31xf32> -> vector<8x32xf32>
    %33 = arith.select %26, %29, %32 : vector<8x32xi1>, vector<8x32xf32>
    %34 = arith.mulf %17, %20 : vector<8x32xf32>
    %35 = arith.mulf %33, %21 : vector<8x32xf32>
    %36 = arith.addf %34, %35 : vector<8x32xf32>
    %37 = vector.extract_strided_slice %18 {offsets = [0, 1], sizes = [8, 31], strides = [1, 1]} : vector<8x32xf32> to vector<8x31xf32>
    %38 = vector.extract_strided_slice %18 {offsets = [0, 0], sizes = [8, 1], strides = [1, 1]} : vector<8x32xf32> to vector<8x1xf32>
    %39 = tpu.concatenate %37, %38 in 1 : vector<8x31xf32>, vector<8x1xf32> -> vector<8x32xf32>
    %40 = vector.extract_strided_slice %18 {offsets = [0, 31], sizes = [8, 1], strides = [1, 1]} : vector<8x32xf32> to vector<8x1xf32>
    %41 = vector.extract_strided_slice %18 {offsets = [0, 0], sizes = [8, 31], strides = [1, 1]} : vector<8x32xf32> to vector<8x31xf32>
    %42 = tpu.concatenate %40, %41 in 1 : vector<8x1xf32>, vector<8x31xf32> -> vector<8x32xf32>
    %43 = arith.select %26, %39, %42 : vector<8x32xi1>, vector<8x32xf32>
    %44 = arith.mulf %18, %20 : vector<8x32xf32>
    %45 = arith.mulf %43, %21 : vector<8x32xf32>
    %46 = arith.addf %44, %45 : vector<8x32xf32>
    %c0_12 = arith.constant 0 : index
    %c0_13 = arith.constant 0 : index
    %47 = vector.load %arg11[%c0_12, %c0_13] : memref<8x32xf32, #tpu.memory_space<vmem>>, vector<8x32xf32>
    tpu.vector_store %arg11[%c0_12, %c0_13], %46 {strides = array<i32>} : memref<8x32xf32, #tpu.memory_space<vmem>>, vector<8x32xf32>,
    %c0_14 = arith.constant 0 : index
    %c0_15 = arith.constant 0 : index
    %48 = vector.load %arg12[%c0_14, %c0_15] : memref<8x32xf32, #tpu.memory_space<vmem>>, vector<8x32xf32>
    tpu.vector_store %arg12[%c0_14, %c0_15], %19 {strides = array<i32>} : memref<8x32xf32, #tpu.memory_space<vmem>>, vector<8x32xf32>,
    %49 = vector.extract_strided_slice %36 {offsets = [0, 0], sizes = [8, 8], strides = [1, 1]} : vector<8x32xf32> to vector<8x8xf32>
    %50 = vector.extract_strided_slice %36 {offsets = [0, 8], sizes = [8, 8], strides = [1, 1]} : vector<8x32xf32> to vector<8x8xf32>
    %51 = vector.extract_strided_slice %36 {offsets = [0, 16], sizes = [8, 8], strides = [1, 1]} : vector<8x32xf32> to vector<8x8xf32>
    %52 = vector.extract_strided_slice %36 {offsets = [0, 24], sizes = [8, 8], strides = [1, 1]} : vector<8x32xf32> to vector<8x8xf32>
    %53 = vector.shape_cast %49 : vector<8x8xf32> to vector<1x8x8xf32>
    %54 = vector.shape_cast %50 : vector<8x8xf32> to vector<1x8x8xf32>
    %55 = vector.shape_cast %51 : vector<8x8xf32> to vector<1x8x8xf32>
    %56 = vector.shape_cast %52 : vector<8x8xf32> to vector<1x8x8xf32>
    %57 = tpu.concatenate %53, %54, %55, %56 in 0 : vector<1x8x8xf32>, vector<1x8x8xf32>, vector<1x8x8xf32>, vector<1x8x8xf32> -> vector<4x8x8xf32>
    %58 = arith.truncf %57 : vector<4x8x8xf32> to vector<4x8x8xbf16>
    %59 = vector.extract_strided_slice %46 {offsets = [0, 0], sizes = [8, 8], strides = [1, 1]} : vector<8x32xf32> to vector<8x8xf32>
    %60 = vector.extract_strided_slice %46 {offsets = [0, 8], sizes = [8, 8], strides = [1, 1]} : vector<8x32xf32> to vector<8x8xf32>
    %61 = vector.extract_strided_slice %46 {offsets = [0, 16], sizes = [8, 8], strides = [1, 1]} : vector<8x32xf32> to vector<8x8xf32>
    %62 = vector.extract_strided_slice %46 {offsets = [0, 24], sizes = [8, 8], strides = [1, 1]} : vector<8x32xf32> to vector<8x8xf32>
    %63 = vector.shape_cast %59 : vector<8x8xf32> to vector<1x8x8xf32>
    %64 = vector.shape_cast %60 : vector<8x8xf32> to vector<1x8x8xf32>
    %65 = vector.shape_cast %61 : vector<8x8xf32> to vector<1x8x8xf32>
    %66 = vector.shape_cast %62 : vector<8x8xf32> to vector<1x8x8xf32>
    %67 = tpu.concatenate %63, %64, %65, %66 in 0 : vector<1x8x8xf32>, vector<1x8x8xf32>, vector<1x8x8xf32>, vector<1x8x8xf32> -> vector<4x8x8xf32>
    %68 = arith.truncf %67 : vector<4x8x8xf32> to vector<4x8x8xbf16>
    %69 = vector.extract_strided_slice %19 {offsets = [0, 0], sizes = [8, 8], strides = [1, 1]} : vector<8x32xf32> to vector<8x8xf32>
    %70 = vector.extract_strided_slice %19 {offsets = [0, 8], sizes = [8, 8], strides = [1, 1]} : vector<8x32xf32> to vector<8x8xf32>
    %71 = vector.extract_strided_slice %19 {offsets = [0, 16], sizes = [8, 8], strides = [1, 1]} : vector<8x32xf32> to vector<8x8xf32>
    %72 = vector.extract_strided_slice %19 {offsets = [0, 24], sizes = [8, 8], strides = [1, 1]} : vector<8x32xf32> to vector<8x8xf32>
    %73 = vector.shape_cast %69 : vector<8x8xf32> to vector<1x8x8xf32>
    %74 = vector.shape_cast %70 : vector<8x8xf32> to vector<1x8x8xf32>
    %75 = vector.shape_cast %71 : vector<8x8xf32> to vector<1x8x8xf32>
    %76 = vector.shape_cast %72 : vector<8x8xf32> to vector<1x8x8xf32>
    %77 = tpu.concatenate %73, %74, %75, %76 in 0 : vector<1x8x8xf32>, vector<1x8x8xf32>, vector<1x8x8xf32>, vector<1x8x8xf32> -> vector<4x8x8xf32>
    %78 = arith.truncf %77 : vector<4x8x8xf32> to vector<4x8x8xbf16>
    "tpu.trace_start"() <{level = 10 : i32, message = "hqd,hkd->hqk"}> : () -> ()
    %cst_16 = arith.constant dense<0.000000e+00> : vector<4x8x8xf32>
    %79 = tpu.matmul %58, %68, %cst_16 {dimension_numbers = #tpu.dot_dimension_numbers<[2], [2], [1], [1], [0, 0, 0, 1, 1, 1], [0], [0]>} : vector<4x8x8xbf16>, vector<4x8x8xbf16>, vector<4x8x8xf32> -> vector<4x8x8xf32>
    "tpu.trace_stop"() : () -> ()
    %80 = tpu.iota {dimensions = array<i32: 1>} : vector<4x8x8xi32>
    %81 = tpu.iota {dimensions = array<i32: 2>} : vector<4x8x8xi32>
    %82 = arith.cmpi sge, %80, %81 : vector<4x8x8xi32>
    %cst_17 = arith.constant -1.000000e+30 : f32
    %83 = vector.broadcast %cst_17 : f32 to vector<4x8x8xf32>
    %84 = arith.select %82, %79, %83 : vector<4x8x8xi1>, vector<4x8x8xf32>
    %cst_18 = arith.constant dense<0xFF800000> : vector<4x8xf32>
    %85 = vector.multi_reduction <maximumf>, %84, %cst_18 [2] : vector<4x8x8xf32> to vector<4x8xf32>
    %86 = vector.shape_cast %85 : vector<4x8xf32> to vector<4x8x1xf32>
    %87 = vector.broadcast %86 : vector<4x8x1xf32> to vector<4x8x8xf32>
    %88 = arith.subf %84, %87 : vector<4x8x8xf32>
    %89 = math.exp %88 : vector<4x8x8xf32>
    %cst_19 = arith.constant dense<0.000000e+00> : vector<4x8xf32>
    %90 = vector.multi_reduction <add>, %89, %cst_19 [2] : vector<4x8x8xf32> to vector<4x8xf32>
    %91 = vector.shape_cast %90 : vector<4x8xf32> to vector<4x8x1xf32>
    %92 = tpu.reciprocal %91 {approx = true} : vector<4x8x1xf32> -> vector<4x8x1xf32>
    %93 = vector.broadcast %92 : vector<4x8x1xf32> to vector<4x8x8xf32>
    %94 = arith.mulf %89, %93 : vector<4x8x8xf32>
    %95 = arith.truncf %94 : vector<4x8x8xf32> to vector<4x8x8xbf16>
    "tpu.trace_start"() <{level = 10 : i32, message = "hqk,hkd->hqd"}> : () -> ()
    %cst_20 = arith.constant dense<0.000000e+00> : vector<4x8x8xf32>
    %96 = tpu.matmul %95, %78, %cst_20 {dimension_numbers = #tpu.dot_dimension_numbers<[2], [1], [1], [2], [0, 0, 0, 1, 1, 2], [0], [0]>} : vector<4x8x8xbf16>, vector<4x8x8xbf16>, vector<4x8x8xf32> -> vector<4x8x8xf32>
    "tpu.trace_stop"() : () -> ()
    %97 = vector.extract_strided_slice %96 {offsets = [0, 0, 0], sizes = [1, 8, 8], strides = [1, 1, 1]} : vector<4x8x8xf32> to vector<1x8x8xf32>
    %98 = vector.shape_cast %97 : vector<1x8x8xf32> to vector<8x8xf32>
    %99 = vector.extract_strided_slice %96 {offsets = [1, 0, 0], sizes = [1, 8, 8], strides = [1, 1, 1]} : vector<4x8x8xf32> to vector<1x8x8xf32>
    %100 = vector.shape_cast %99 : vector<1x8x8xf32> to vector<8x8xf32>
    %101 = vector.extract_strided_slice %96 {offsets = [2, 0, 0], sizes = [1, 8, 8], strides = [1, 1, 1]} : vector<4x8x8xf32> to vector<1x8x8xf32>
    %102 = vector.shape_cast %101 : vector<1x8x8xf32> to vector<8x8xf32>
    %103 = vector.extract_strided_slice %96 {offsets = [3, 0, 0], sizes = [1, 8, 8], strides = [1, 1, 1]} : vector<4x8x8xf32> to vector<1x8x8xf32>
    %104 = vector.shape_cast %103 : vector<1x8x8xf32> to vector<8x8xf32>
    %105 = tpu.concatenate %98, %100, %102, %104 in 1 : vector<8x8xf32>, vector<8x8xf32>, vector<8x8xf32>, vector<8x8xf32> -> vector<8x32xf32>
    %106 = arith.truncf %105 : vector<8x32xf32> to vector<8x32xbf16>
    %c0_21 = arith.constant 0 : index
    %c0_22 = arith.constant 0 : index
    %107 = vector.load %arg5[%c0_21, %c0_22] : memref<32x32xbf16, #tpu.memory_space<vmem>>, vector<32x32xbf16>
    %cst_23 = arith.constant dense<0.000000e+00> : vector<8x32xf32>
    %108 = tpu.matmul %106, %107, %cst_23 {dimension_numbers = #tpu.dot_dimension_numbers<[1], [0], [0], [1], [0, 0, 1, 1], [], []>} : vector<8x32xbf16>, vector<32x32xbf16>, vector<8x32xf32> -> vector<8x32xf32>
    %109 = arith.addf %0, %108 : vector<8x32xf32>
    %c0_24 = arith.constant 0 : index
    %c0_25 = arith.constant 0 : index
    %110 = vector.load %arg3[%c0_24, %c0_25] : memref<1x32xf32, #tpu.memory_space<vmem>>, vector<1x32xf32>
    %111 = arith.mulf %109, %109 : vector<8x32xf32>
    %cst_26 = arith.constant dense<0.000000e+00> : vector<8xf32>
    %112 = vector.multi_reduction <add>, %111, %cst_26 [1] : vector<8x32xf32> to vector<8xf32>
    %113 = vector.shape_cast %112 : vector<8xf32> to vector<8x1xf32>
    %cst_27 = arith.constant 3.200000e+01 : f32
    %114 = vector.broadcast %cst_27 : f32 to vector<8x1xf32>
    %115 = arith.divf %113, %114 : vector<8x1xf32>
    %cst_28 = arith.constant 9.99999974E-6 : f32
    %116 = vector.broadcast %cst_28 : f32 to vector<8x1xf32>
    %117 = arith.addf %115, %116 : vector<8x1xf32>
    %118 = math.rsqrt %117 : vector<8x1xf32>
    %119 = vector.broadcast %118 : vector<8x1xf32> to vector<8x32xf32>
    %120 = arith.mulf %109, %119 : vector<8x32xf32>
    %121 = vector.broadcast %110 : vector<1x32xf32> to vector<8x32xf32>
    %122 = arith.mulf %120, %121 : vector<8x32xf32>
    %123 = arith.truncf %122 : vector<8x32xf32> to vector<8x32xbf16>
    %c0_29 = arith.constant 0 : index
    %c0_30 = arith.constant 0 : index
    %124 = vector.load %arg6[%c0_29, %c0_30] : memref<32x128xbf16, #tpu.memory_space<vmem>>, vector<32x128xbf16>
    %cst_31 = arith.constant dense<0.000000e+00> : vector<8x128xf32>
    %125 = tpu.matmul %123, %124, %cst_31 {dimension_numbers = #tpu.dot_dimension_numbers<[1], [0], [0], [1], [0, 0, 1, 1], [], []>} : vector<8x32xbf16>, vector<32x128xbf16>, vector<8x128xf32> -> vector<8x128xf32>
    %126 = vector.extract_strided_slice %125 {offsets = [0, 0], sizes = [8, 64], strides = [1, 1]} : vector<8x128xf32> to vector<8x64xf32>
    %127 = vector.extract_strided_slice %125 {offsets = [0, 64], sizes = [8, 64], strides = [1, 1]} : vector<8x128xf32> to vector<8x64xf32>
    %128 = arith.negf %126 : vector<8x64xf32>
    %129 = math.exp %128 : vector<8x64xf32>
    %cst_32 = arith.constant 1.000000e+00 : f32
    %130 = vector.broadcast %cst_32 : f32 to vector<8x64xf32>
    %131 = arith.addf %130, %129 : vector<8x64xf32>
    %132 = arith.divf %130, %131 : vector<8x64xf32>
    %133 = arith.mulf %126, %132 : vector<8x64xf32>
    %134 = arith.mulf %133, %127 : vector<8x64xf32>
    %135 = arith.truncf %134 : vector<8x64xf32> to vector<8x64xbf16>
    %c0_33 = arith.constant 0 : index
    %c0_34 = arith.constant 0 : index
    %136 = vector.load %arg7[%c0_33, %c0_34] : memref<64x32xbf16, #tpu.memory_space<vmem>>, vector<64x32xbf16>
    %cst_35 = arith.constant dense<0.000000e+00> : vector<8x32xf32>
    %137 = tpu.matmul %135, %136, %cst_35 {dimension_numbers = #tpu.dot_dimension_numbers<[1], [0], [0], [1], [0, 0, 1, 1], [], []>} : vector<8x64xbf16>, vector<64x32xbf16>, vector<8x32xf32> -> vector<8x32xf32>
    %138 = arith.addf %109, %137 : vector<8x32xf32>
    %c0_36 = arith.constant 0 : index
    %c0_37 = arith.constant 0 : index
    %139 = vector.load %arg10[%c0_36, %c0_37] : memref<8x32xf32, #tpu.memory_space<vmem>>, vector<8x32xf32>
    tpu.vector_store %arg10[%c0_36, %c0_37], %138 {strides = array<i32>} : memref<8x32xf32, #tpu.memory_space<vmem>>, vector<8x32xf32>,
    return
  }
  func.func @transform_0(%arg0: i32) -> (i32, i32) {
    %c0_i32 = arith.constant 0 : i32
    %c0_i32_0 = arith.constant 0 : i32
    return %arg0, %c0_i32 : i32, i32
  }
  func.func @transform_1(%arg0: i32) -> (i32, i32) {
    %c0_i32 = arith.constant 0 : i32
    %c0_i32_0 = arith.constant 0 : i32
    %c0_i32_1 = arith.constant 0 : i32
    return %c0_i32, %c0_i32_0 : i32, i32
  }
  func.func @transform_2(%arg0: i32) -> (i32, i32) {
    %c0_i32 = arith.constant 0 : i32
    %c0_i32_0 = arith.constant 0 : i32
    %c0_i32_1 = arith.constant 0 : i32
    return %c0_i32, %c0_i32_0 : i32, i32
  }
  func.func @transform_3(%arg0: i32) -> (i32, i32) {
    %c0_i32 = arith.constant 0 : i32
    %c0_i32_0 = arith.constant 0 : i32
    %c0_i32_1 = arith.constant 0 : i32
    return %c0_i32, %c0_i32_0 : i32, i32
  }
  func.func @transform_4(%arg0: i32) -> (i32, i32) {
    %c0_i32 = arith.constant 0 : i32
    %c0_i32_0 = arith.constant 0 : i32
    %c0_i32_1 = arith.constant 0 : i32
    return %c0_i32, %c0_i32_0 : i32, i32
  }
  func.func @transform_5(%arg0: i32) -> (i32, i32) {
    %c0_i32 = arith.constant 0 : i32
    %c0_i32_0 = arith.constant 0 : i32
    %c0_i32_1 = arith.constant 0 : i32
    return %c0_i32, %c0_i32_0 : i32, i32
  }
  func.func @transform_6(%arg0: i32) -> (i32, i32) {
    %c0_i32 = arith.constant 0 : i32
    %c0_i32_0 = arith.constant 0 : i32
    %c0_i32_1 = arith.constant 0 : i32
    return %c0_i32, %c0_i32_0 : i32, i32
  }
  func.func @transform_7(%arg0: i32) -> (i32, i32) {
    %c0_i32 = arith.constant 0 : i32
    %c0_i32_0 = arith.constant 0 : i32
    %c0_i32_1 = arith.constant 0 : i32
    return %c0_i32, %c0_i32_0 : i32, i32
  }
  func.func @transform_8(%arg0: i32) -> (i32, i32) {
    %c0_i32 = arith.constant 0 : i32
    %c0_i32_0 = arith.constant 0 : i32
    %c0_i32_1 = arith.constant 0 : i32
    return %c0_i32, %c0_i32_0 : i32, i32
  }
  func.func @transform_9(%arg0: i32) -> (i32, i32) {
    %c0_i32 = arith.constant 0 : i32
    %c0_i32_0 = arith.constant 0 : i32
    return %arg0, %c0_i32 : i32, i32
  }
  func.func @transform_10(%arg0: i32) -> (i32, i32) {
    %c0_i32 = arith.constant 0 : i32
    %c0_i32_0 = arith.constant 0 : i32
    return %arg0, %c0_i32 : i32, i32
  }
  func.func @transform_11(%arg0: i32) -> (i32, i32) {
    %c0_i32 = arith.constant 0 : i32
    %c0_i32_0 = arith.constant 0 : i32
    return %arg0, %c0_i32 : i32, i32
  }
}

</mosaic_0001>

<bundles_post_ra>
// kernel: glm_block_forward.1
= control target key start
LH: loop header
LB: loop body
LE: loop exit
PB: predicated region body
PF: predicated region fallthrough
CT: control target
= control target key end

     0   :  { %s1682_s17 = smov 0   ;;  %s1902_s0 = inlined_call_operand.vmem [shape: f32[16,32], index: 0, kind: input, shape index: {}]   ;;  %s1903_s1 = inlined_call_operand.vmem [shape: f32[1,32], index: 1, kind: input, shape index: {}]   ;;  %s1904_s2 = inlined_call_operand.vmem [shape: f32[1,32], index: 2, kind: input, shape index: {}]   ;;  %s1905_s3 = inlined_call_operand.vmem [shape: bf16[32,96], index: 3, kind: input, shape index: {}]   ;;  %s1906_s4 = inlined_call_operand.vmem [shape: bf16[32,32], index: 4, kind: input, shape index: {}]   ;;  %s1907_s5 = inlined_call_operand.vmem [shape: bf16[32,128], index: 5, kind: input, shape index: {}]   ;;  %s1908_s6 = inlined_call_operand.vmem [shape: bf16[64,32], index: 6, kind: input, shape index: {}]   ;;  %s1909_s7 = inlined_call_operand.vmem [shape: f32[8,32], index: 7, kind: input, shape index: {}]   ;;  %s1910_s8 = inlined_call_operand.vmem [shape: f32[8,32], index: 8, kind: input, shape index: {}]   ;;  %s1911_s9 = inlined_call_operand.vmem [shape: f32[16,32], index: 9, kind: output, shape index: {0}]   ;;  %s1912_s10 = inlined_call_operand.vmem [shape: f32[16,32], index: 10, kind: output, shape index: {1}]   ;;  %s1913_s11 = inlined_call_operand.vmem [shape: f32[16,32], index: 11, kind: output, shape index: {2}]  }
   0x1 LB: > { %s1388_s18 = sadd.s32 4294967295, %s1603_s17   ;;  %p1392_p0 = scmp.ge.s32.totalorder %s1603_s17, 1  ;;  %s1603_s17 = sphi %s1682_s17, %s22_s17  }
   0x2   : > { %p341_p1 = scmp.lt.s32.totalorder %s1603_s17, 3 }
   0x4   : > { %p342_p2 = pnand %p1392_p0, %p341_p1 }
   0x5   : > { %p387_p3 = scmp.lt.s32.totalorder (!%p342_p2), %s1388_s18, 1  ;;  %vm407_vm0 = vcmask (!%p342_p2), 261120   ;;  %v1563_v3 = vld [vmem:[%s1905_s3] sm:$0xff] (!%p342_p2)   ;;  %v1605_v4 = vmov (!%p342_p2), 0.0   ;;  %vm1606_vm1 = vmmov (!%p342_p2), 0   ;;  %v1564_v5 = vld [vmem:[%s1905_s3 + $0x8] sm:$0xff] (!%p342_p2)   ;;  %v485_v20 = vlaneseq (!%p342_p2) }
   0x6   : > { %345 = sbr.rel (%p342_p2) target bundleno = 2701 (0xa8d), region = 56  ;;  %1454 = vmatprep.subr.bf16.mxu0 (!%p342_p2), %v1605_v4  ;;  %1458 = vmatprep.mubr.msk.bf16.mxu0 (!%p342_p2), %vm1606_vm1, %v1605_v4  ;;  %v1397_v10 = vld [vmem:[%s1903_s1] ss:$0 sm:$0xff] (!%p342_p2)  ;;  %s1607_s12 = smov (!%p342_p2), 97   ;;  %vm504_vm2 = vcmask (!%p342_p2), 7168   ;;  %vm496_vm3 = vcmask (!%p342_p2), 252928  }
   0x7   : > { %1455 = vmatpush3.bf16.msra.mxu0 (!%p342_p2), %v1563_v3  ;;  %1462 = vmatprep.subr.bf16.mxu1 (!%p342_p2), %v1605_v4  ;;  %v483_v14 = vld [vmem:[%s1909_s7] sm:$0xff] (!%p342_p2)  ;;  %s1608_s13 = smov (!%p342_p2), 127   ;;  %s1609_s14 = smov (!%p342_p2), 95   ;;  %v1734_v21 = vand.u32 (!%p342_p2), 127, %v485_v20  ;;  %vm582_vm5 = vcmask (!%p342_p2), 64512   ;;  %v777_v3 = vshrl.u32 (!%p342_p2), %v485_v20, 7 }
   0x8   : > { %1456 = vmatprep.subr.bf16.mxu0 (!%p342_p2), %v1605_v4  ;;  %1464 = vmatprep.mubr.msk.bf16.mxu1 (!%p342_p2), %vm1606_vm1, %v1605_v4  ;;  %s1610_s15 = smov (!%p342_p2), 1   ;;  %s1611_s16 = smov (!%p342_p2), 65   ;;  %v484_v30 = vld [vmem:[%s1910_s8] sm:$0xff] (!%p342_p2)  ;;  %vm837_vm7 = vcmask (!%p342_p2), 1043456   ;;  %vm1041_vm8 = vcmask (!%p342_p2), 130048   ;;  %vm1043_vm9 = vcmask (!%p342_p2), 195584  }
   0x9   : > { %v487_v24 = vand.u32 (!%p342_p2), 1, %v1734_v21  ;;  %s1614_s23 = smov (!%p342_p2), 120   ;;  %s1615_s24 = smov (!%p342_p2), 31   ;;  %vm778_vm6 = vcmp.ge.s32.totalorder (!%p342_p2), %v777_v3, %v1734_v21  ;;  %vm1227_vm10 = vcmask (!%p342_p2), 523264  }
   0xa   : > { %s1616_s25 = smov (!%p342_p2), 112   ;;  %s1617_s26 = smov (!%p342_p2), 96  }
   0xb   : > { %1457 = vmatpush3.bf16.msra.mxu0 (!%p342_p2), %v1564_v5  ;;  %vm1737_vm4 = vcmp.eq.s32.totalorder (!%p342_p2), %v487_v24, 0  ;;  %s1618_s27 = smov (!%p342_p2), 64   ;;  %s1619_s28 = smov (!%p342_p2), 8  }
   0xc   : > { %1468 = vmatprep.subr.bf16.mxu0 (!%p342_p2), %v1605_v4 }
   0xd   : > { %s1917_s18 = smov (!%p387_p3, %s1388_s18), 1 }
   0xe   : > { %s1690_s19 = sshll.u32 %s1917_s18, 3  ;;  %s1612_s18 = smov 32  }
   0xf   : > { %s390_s22 = scalar_lea.vmem %s1902_s0, %s1690_s19  ;;  %s402_s20 = scalar_lea.vmem %s1913_s11, %s1690_s19 }
  0x10   : > { %v1696_v0 = vld [vmem:[%s390_s22] sm:$0xff]  ;;  %s1613_s22 = smov 104  }
  0x11   : > { %v406_v1 = vmul.f32 %v1696_v0, %v1696_v0 }
  0x13   : > { %v408_v2 = vsel %vm407_vm0, %v406_v1, 0.0 }
  0x14   : > { %409 = vadd.xlane.f32.xlu0 %v408_v2 }
  0xa1   : > { %v410_v6 = vpop.xlane.xlu0 %409 }
  0xa2   : > { %v412_v7 = vmul.f32 0.03125, %v410_v6 }
  0xa4   : > { %v413_v8 = vadd.f32 1e-05, %v412_v7 }
  0xa6   : > { %1573 = vrsqrt.f32 %v413_v8 }
  0xb0   : > { %v1574_v9 = vpop.eup %1573 }
  0xb1   : > { %v415_v11 = vmul.f32 %v1574_v9, %v1696_v0 }
  0xb3   : > { %v422_v12 = vmul.f32 %v1397_v10, %v415_v11 }
  0xb5   : > { %v423_v13 = vpack.c.bf16 %v422_v12, %v422_v12 }
  0xb7   : > { %1459 = vmatmul.mubr.msk.bf16.vlgmr.msra.gmra.mrb[0].mxu0 %vm407_vm0, %v423_v13 }
  0xb8   : > { %1470 = vmatprep.mubr.msk.bf16.mxu0 %vm1606_vm1, %v1605_v4 }
 0x18a   : > { %v1725_v15 = vpop.f32.mrb[0].mxu0 }
 0x18b   : > { %498 = vrot.lane.b32.xlu1 %v1725_v15, %s1607_s12  ;;  %490 = vrot.lane.b32.xlu0 %v1725_v15, %s1608_s13  ;;  %v1460_v16 = vpop.f32.mrb[1].mxu0  ;;  %v507_v17 = vmul.f32 %v483_v14, %v1725_v15 }
 0x18c   : > { %v480_v18 = vpop.f32.mrb[2].mxu0 }
 0x18d   : > { %v1461_v19 = vpop.f32.mrb[3].mxu0 }
 0x18f   : > { %510 = vrot.lane.b32.xlu1 %v1725_v15, %s1609_s14  ;;  %501 = vrot.lane.b32.xlu0 %v1725_v15, %s1610_s15  ;;  %s1620_s14 = smov 24   ;;  %s1621_s15 = smov 16  }
 0x193   : > { %514 = vrot.lane.b32.xlu1 %v1725_v15, %s1611_s16 }
 0x197   : > { %520 = vrot.lane.b32.xlu1 %v483_v14, %s1612_s18 }
 0x1fd   : > { %v499_v22 = vpop.permute.xlu1 %498  ;;  %v491_v23 = vpop.permute.xlu0 %490 }
 0x201   : > { %v511_v25 = vpop.permute.xlu1 %510  ;;  %v502_v26 = vpop.permute.xlu0 %501 }
 0x202   : > { %v505_v27 = vsel %vm504_vm2, %v499_v22, %v502_v26  ;;  %v513_v31 = vsel %vm496_vm3, %v511_v25, %v491_v23 }
 0x205   : > { %v515_v29 = vpop.permute.xlu1 %514 }
 0x206   : > { %v517_v32 = vsel %vm504_vm2, %v515_v29, %v499_v22 }
 0x207   : > { %v518_v33 = vsel %vm1737_vm4, %v513_v31, %v517_v32  ;;  %v575_v31 = vpack.c.bf16 %v1725_v15, %v1725_v15 }
 0x208   : > { %v524_v34 = vmul.f32 %v518_v33, %v484_v30 }
 0x209   : > { %v521_v35 = vpop.permute.xlu1 %520 }
 0x20a   : > { %526 = vrot.lane.b32.xlu1 %v524_v34, %s1612_s18  ;;  %v523_v36 = vmul.f32 %v521_v35, %v1725_v15  ;;  %s398_s18 = scalar_lea.vmem %s1912_s10, %s1690_s19 }
 0x27c   : > { %v527_v37 = vpop.permute.xlu1 %526 }
 0x27d   : > { %v1748_v38 = vadd.f32 %v527_v37, %v523_v36 }
 0x27f   : > { %559 = vrot.lane.b32.xlu0 %v1748_v38, %s1613_s22  ;;  %553 = vrot.lane.b32.xlu1 %v1748_v38, %s1614_s23  ;;  %v562_v39 = vpack.c.bf16 %v1748_v38, %v1748_v38 }
 0x283   : > { %493 = vrot.lane.b32.xlu1 %v1725_v15, %s1615_s24 }
 0x287   : > { %556 = vrot.lane.b32.xlu1 %v1748_v38, %s1616_s25 }
 0x28b   : > { %580 = vrot.lane.b32.xlu1 %v562_v39, %s1617_s26 }
 0x2f1   : > { %v554_v40 = vpop.permute.xlu1 %553  ;;  %v560_v49 = vpop.permute.xlu0 %559 }
 0x2f2   : > { %v563_v41 = vpack.c.bf16 %v554_v40, %v554_v40  ;;  %v565_v51 = vpack.c.bf16 %v560_v49, %v560_v49 }
 0x2f4   : > { %630 = vrot.lane.b32.xlu0 %v563_v41, %s1617_s26 }
 0x2f5   : > { %v494_v42 = vpop.permute.xlu1 %493 }
 0x2f6   : > { %v497_v43 = vsel %vm496_vm3, %v491_v23, %v494_v42 }
 0x2f7   : > { %v506_v44 = vsel %vm1737_vm4, %v497_v43, %v505_v27 }
 0x2f8   : > { %v508_v45 = vmul.f32 %v506_v44, %v484_v30 }
 0x2f9   : > { %v557_v46 = vpop.permute.xlu1 %556 }
 0x2fa   : > { %v509_v47 = vadd.f32 %v508_v45, %v507_v17  ;;  %v564_v48 = vpack.c.bf16 %v557_v46, %v557_v46 }
 0x2fc   : > { %679 = vrot.lane.b32.xlu0 %v564_v48, %s1617_s26  ;;  %540 = vrot.lane.b32.xlu1 %v509_v47, %s1614_s23  ;;  %v549_v53 = vpack.c.bf16 %v509_v47, %v509_v47 }
 0x2fd   : > { %v581_v50 = vpop.permute.xlu1 %580 }
 0x2fe   : > { %v587_v52 = vsel %vm582_vm5, %v581_v50, 0 }
 0x2ff   : > { %1463 = vmatpush3.bf16.xpose.msra.mxu1 %v587_v52 }
 0x300   : > { %543 = vrot.lane.b32.xlu0 %v509_v47, %s1616_s25  ;;  %728 = vrot.lane.b32.xlu1 %v565_v51, %s1617_s26 }
 0x301   : > { %1474 = vmatprep.subr.bf16.mxu1 %v1605_v4 }
 0x304   : > { %546 = vrot.lane.b32.xlu1 %v509_v47, %s1613_s22 }
 0x306   : > { %1465 = vmatmul.mubr.msk.bf16.vlgmr.msra.gmra.mrb[0].mxu1 %vm582_vm5, %v549_v53 }
 0x307   : > { %1476 = vmatprep.mubr.msk.bf16.mxu1 %vm1606_vm1, %v1605_v4 }
 0x366   : > { %v631_v54 = vpop.permute.xlu0 %630 }
 0x367   : > { %v636_v55 = vsel %vm582_vm5, %v631_v54, 0 }
 0x368   : > { %1469 = vmatpush3.bf16.xpose.msra.mxu0 %v636_v55 }
 0x369   : > { %1480 = vmatprep.subr.bf16.mxu0 %v1605_v4 }
 0x36e   : > { %v680_v56 = vpop.permute.xlu0 %679  ;;  %v541_v57 = vpop.permute.xlu1 %540 }
 0x36f   : > { %v685_v58 = vsel %vm582_vm5, %v680_v56, 0  ;;  %v550_v59 = vpack.c.bf16 %v541_v57, %v541_v57 }
 0x370   : > { %1475 = vmatpush3.bf16.xpose.msra.mxu1 %v685_v58 }
 0x371   : > { %1471 = vmatmul.mubr.msk.bf16.vlgmr.msra.gmra.mrb[4].mxu0 %vm582_vm5, %v550_v59  ;;  %1486 = vmatprep.subr.bf16.mxu1 %v1605_v4 }
 0x372   : > { %v544_v60 = vpop.permute.xlu0 %543  ;;  %v729_v61 = vpop.permute.xlu1 %728  ;;  %1482 = vmatprep.mubr.msk.bf16.mxu0 %vm1606_vm1, %v1605_v4 }
 0x373   : > { %v734_v62 = vsel %vm582_vm5, %v729_v61, 0  ;;  %v551_v63 = vpack.c.bf16 %v544_v60, %v544_v60 }
 0x374   : > { %1481 = vmatpush3.bf16.xpose.msra.mxu0 %v734_v62 }
 0x375   : > { %1492 = vmatprep.subr.bf16.mxu0 %v1605_v4 }
 0x376   : > { %v547_v1 = vpop.permute.xlu1 %546 }
 0x377   : > { %1477 = vmatmul.mubr.msk.bf16.vlgmr.msra.gmra.mrb[4].mxu1 %vm582_vm5, %v551_v63  ;;  %v552_v2 = vpack.c.bf16 %v547_v1, %v547_v1 }
 0x378   : > { %1488 = vmatprep.mubr.msk.bf16.mxu1 %vm1606_vm1, %v1605_v4 }
 0x37b   : > { %1483 = vmatmul.mubr.msk.bf16.vlgmr.msra.gmra.mrb[8].mxu0 %vm582_vm5, %v552_v2 }
 0x37c   : > { %1494 = vmatprep.mubr.msk.bf16.mxu0 %vm1606_vm1, %v1605_v4 }
 0x3d9   : > { %v623_v5 = vpop.f32.mrb[0].mxu1 }
 0x3da   : > { %v779_v6 = vsel %vm778_vm6, %v623_v5, -1e+30  ;;  %v1466_v7 = vpop.f32.mrb[1].mxu1 }
 0x3db   : > { %v626_v8 = vpop.f32.mrb[2].mxu1  ;;  %v783_v9 = vsel %vm582_vm5, %v779_v6, -inf }
 0x3dc   : > { %784 = vmax.xlane.f32.xlu0 %v783_v9  ;;  %v1467_v10 = vpop.f32.mrb[3].mxu1 }
 0x444   : > { %v672_v11 = vpop.f32.mrb[4].mxu0 }
 0x445   : > { %v780_v12 = vsel %vm778_vm6, %v672_v11, -1e+30  ;;  %v1472_v13 = vpop.f32.mrb[5].mxu0 }
 0x446   : > { %v675_v14 = vpop.f32.mrb[6].mxu0  ;;  %v786_v16 = vsel %vm582_vm5, %v780_v12, -inf }
 0x447   : > { %787 = vmax.xlane.f32.xlu1 %v786_v16  ;;  %v1473_v17 = vpop.f32.mrb[7].mxu0 }
 0x44a   : > { %v721_v18 = vpop.f32.mrb[4].mxu1 }
 0x44b   : > { %v781_v19 = vsel %vm778_vm6, %v721_v18, -1e+30  ;;  %v1478_v20 = vpop.f32.mrb[5].mxu1 }
 0x44c   : > { %v724_v22 = vpop.f32.mrb[6].mxu1  ;;  %v789_v23 = vsel %vm582_vm5, %v781_v19, -inf }
 0x44d   : > { %790 = vmax.xlane.f32.xlu0 %v789_v23  ;;  %v1479_v24 = vpop.f32.mrb[7].mxu1 }
 0x44e   : > { %v770_v25 = vpop.f32.mrb[8].mxu0 }
 0x44f   : > { %v782_v26 = vsel %vm778_vm6, %v770_v25, -1e+30  ;;  %v1484_v27 = vpop.f32.mrb[9].mxu0 }
 0x450   : > { %v773_v28 = vpop.f32.mrb[10].mxu0  ;;  %v792_v29 = vsel %vm582_vm5, %v782_v26, -inf  ;;  %v1566_v27 = vld [vmem:[%s1906_s4 + $0x8] sm:$0xff]  }
 0x451   : > { %793 = vmax.xlane.f32.xlu0 %v792_v29  ;;  %v1485_v30 = vpop.f32.mrb[11].mxu0 }
 0x458   : > { %566 = vrot.lane.b32.xlu1 %v1725_v15, %s1614_s23  ;;  %s394_s23 = scalar_lea.vmem %s1911_s9, %s1690_s19 }
 0x45c   : > { %572 = vrot.lane.b32.xlu1 %v1725_v15, %s1613_s22 }
 0x467   : > { %569 = vrot.lane.b32.xlu0 %v1725_v15, %s1616_s25 }
 0x469   : > { %v785_v33 = vpop.xlane.xlu0 %784 }
 0x46a   : > { %v795_v48 = vsub.f32 %v779_v6, %v785_v33 }
 0x46b   : > { %832 = vrot.lane.b32.xlu0 %v575_v31, %s1618_s27 }
 0x46c   : > { %v799_v50 = vmul.f32 1.442695, %v795_v48 }
 0x4d4   : > { %v788_v21 = vpop.xlane.xlu1 %787 }
 0x4d5   : > { %v796_v32 = vsub.f32 %v780_v12, %v788_v21 }
 0x4d7   : > { %v801_v34 = vmul.f32 1.442695, %v796_v32 }
 0x4d8   : > { %v567_v35 = vpop.permute.xlu1 %566 }
 0x4d9   : > { %1575 = vpow2.f32 %v801_v34  ;;  %v576_v36 = vpack.c.bf16 %v567_v35, %v567_v35 }
 0x4da   : > { %v791_v37 = vpop.xlane.xlu0 %790 }
 0x4db   : > { %v797_v39 = vsub.f32 %v781_v19, %v791_v37  ;;  %882 = vrot.lane.b32.xlu1 %v576_v36, %s1618_s27 }
 0x4dc   : > { %v573_v54 = vpop.permute.xlu1 %572 }
 0x4dd   : > { %v803_v40 = vmul.f32 1.442695, %v797_v39  ;;  %v578_v57 = vpack.c.bf16 %v573_v54, %v573_v54  ;;  %v1567_v54 = vld [vmem:[%s1907_s5] sm:$0xff]  }
 0x4de   : > { %v794_v41 = vpop.xlane.xlu0 %793 }
 0x4df   : > { %1577 = vpow2.f32 %v803_v40  ;;  %v798_v51 = vsub.f32 %v782_v26, %v794_v41  ;;  %v1565_v26 = vld [vmem:[%s1906_s4] sm:$0xff]  }
 0x4e0   : > { %1579 = vpow2.f32 %v799_v50 }
 0x4e1   : > { %v805_v52 = vmul.f32 1.442695, %v798_v51 }
 0x4e2   : > { %v570_v42 = vpop.permute.xlu0 %569 }
 0x4e3   : > { %v1576_v43 = vpop.eup %1575  ;;  %1581 = vpow2.f32 %v805_v52  ;;  %v577_v59 = vpack.c.bf16 %v570_v42, %v570_v42 }
 0x4e4   : > { %v810_v44 = vsel %vm582_vm5, %v1576_v43, 0.0 }
 0x4e5   : > { %811 = vadd.xlane.f32.xlu0 %v810_v44 }
 0x4e6   : > { %v833_v45 = vpop.permute.xlu0 %832 }
 0x4e7   : > { %v839_v46 = vsel %vm837_vm7, %v833_v45, 0 }
 0x4e8   : > { %1487 = vmatpush3.bf16.msra.mxu1 %v839_v46 }
 0x4e9   : > { %v1578_v47 = vpop.eup %1577  ;;  %1498 = vmatprep.subr.bf16.mxu1 %v1605_v4 }
 0x4ea   : > { %v813_v49 = vsel %vm582_vm5, %v1578_v47, 0.0  ;;  %v1580_v53 = vpop.eup %1579 }
 0x4eb   : > { %814 = vadd.xlane.f32.xlu0 %v813_v49  ;;  %v807_v55 = vsel %vm582_vm5, %v1580_v53, 0.0 }
 0x4ed   : > { %v1582_v56 = vpop.eup %1581 }
 0x4ee   : > { %v816_v58 = vsel %vm582_vm5, %v1582_v56, 0.0 }
 0x4ff   : > { %808 = vadd.xlane.f32.xlu1 %v807_v55  ;;  %v1568_v55 = vld [vmem:[%s1907_s5 + $0x8] sm:$0xff]  }
 0x501   : > { %980 = vrot.lane.b32.xlu0 %v578_v57, %s1618_s27 }
 0x503   : > { %817 = vadd.xlane.f32.xlu1 %v816_v58 }
 0x514   : > { %931 = vrot.lane.b32.xlu1 %v577_v59, %s1618_s27  ;;  %v1412_v59 = vld [vmem:[%s1904_s2] ss:$0 sm:$0xff] }
 0x54d   : > { %v883_v60 = vpop.permute.xlu1 %882 }
 0x54e   : > { %v888_v61 = vsel %vm837_vm7, %v883_v60, 0 }
 0x54f   : > { %1493 = vmatpush3.bf16.msra.mxu0 %v888_v61 }
 0x550   : > { %1504 = vmatprep.subr.bf16.mxu0 %v1605_v4 }
 0x572   : > { %v812_v62 = vpop.xlane.xlu0 %811 }
 0x573   : > { %1583 = vrcp.f32 %v812_v62 }
 0x578   : > { %v815_v63 = vpop.xlane.xlu0 %814 }
 0x57c   : > { %v981_v3 = vpop.permute.xlu0 %980 }
 0x57d   : > { %v1584_v1 = vpop.eup %1583  ;;  %v986_v6 = vsel %vm837_vm7, %v981_v3, 0  ;;  %v1572_v3 = vld [vmem:[%s1908_s6 + $0x18] sm:$0xff]  }
 0x57e   : > { %v824_v2 = vmul.f32 %v1584_v1, %v1576_v43  ;;  %v1570_v1 = vld [vmem:[%s1908_s6 + $0x8] sm:$0xff]  }
 0x580   : > { %v828_v5 = vpack.c.bf16 %v824_v2, %v824_v2  ;;  %v1571_v2 = vld [vmem:[%s1908_s6 + $0x10] sm:$0xff]  }
 0x582   : > { %1495 = vmatmul.mubr.msk.bf16.vlgmr.msra.gmra.mrb[12].mxu0 %vm582_vm5, %v828_v5 }
 0x583   : > { %1505 = vmatpush3.bf16.msra.mxu0 %v986_v6  ;;  %1506 = vmatprep.mubr.msk.bf16.mxu0 %vm1606_vm1, %v1605_v4 }
 0x584   : > { %1518 = vmatprep.subr.bf16.mxu0 %v1605_v4 }
 0x58c   : > { %v809_v7 = vpop.xlane.xlu1 %808 }
 0x58d   : > { %1585 = vrcp.f32 %v809_v7 }
 0x58e   : > { %1587 = vrcp.f32 %v815_v63  ;;  %v1569_v63 = vld [vmem:[%s1908_s6] sm:$0xff]  }
 0x590   : > { %v818_v8 = vpop.xlane.xlu1 %817 }
 0x591   : > { %1589 = vrcp.f32 %v818_v8 }
 0x594   : > { %v932_v11 = vpop.permute.xlu1 %931 }
 0x595   : > { %v937_v17 = vsel %vm837_vm7, %v932_v11, 0 }
 0x597   : > { %v1586_v9 = vpop.eup %1585 }
 0x598   : > { %v823_v10 = vmul.f32 %v1586_v9, %v1580_v53  ;;  %v1588_v12 = vpop.eup %1587 }
 0x599   : > { %v825_v18 = vmul.f32 %v1588_v12, %v1578_v47 }
 0x59a   : > { %v827_v13 = vpack.c.bf16 %v823_v10, %v823_v10 }
 0x59b   : > { %v1590_v14 = vpop.eup %1589  ;;  %v829_v20 = vpack.c.bf16 %v825_v18, %v825_v18 }
 0x59c   : > { %v826_v16 = vmul.f32 %v1590_v14, %v1582_v56  ;;  %1489 = vmatmul.mubr.msk.bf16.vlgmr.msra.gmra.mrb[8].mxu1 %vm582_vm5, %v827_v13 }
 0x59d   : > { %1499 = vmatpush3.bf16.msra.mxu1 %v937_v17  ;;  %1500 = vmatprep.mubr.msk.bf16.mxu1 %vm1606_vm1, %v1605_v4 }
 0x59e   : > { %v830_v19 = vpack.c.bf16 %v826_v16, %v826_v16  ;;  %1510 = vmatprep.subr.bf16.mxu1 %v1605_v4 }
 0x5a0   : > { %1507 = vmatmul.mubr.msk.bf16.vlgmr.msra.gmra.mrb[16].mxu0 %vm582_vm5, %v830_v19 }
 0x5a1   : > { %1522 = vmatprep.mubr.msk.bf16.mxu0 %vm1606_vm1, %v1605_v4  ;;  %1519 = vmatpush3.bf16.msra.mxu0 %v1567_v54 }
 0x5a2   : > { %1520 = vmatprep.subr.bf16.mxu0 %v1605_v4 }
 0x5a4   : > { %1501 = vmatmul.mubr.msk.bf16.vlgmr.msra.gmra.mrb[12].mxu1 %vm582_vm5, %v829_v20 }
 0x5a5   : > { %1514 = vmatprep.mubr.msk.bf16.mxu1 %vm1606_vm1, %v1605_v4  ;;  %1511 = vmatpush3.bf16.msra.mxu1 %v1565_v26 }
 0x5a6   : > { %1512 = vmatprep.subr.bf16.mxu1 %v1605_v4  ;;  %1521 = vmatpush3.bf16.msra.mxu0 %v1568_v55 }
 0x5a9   : > { %1513 = vmatpush3.bf16.msra.mxu1 %v1566_v27 }
 0x5aa   : > { %1526 = vmatprep.subr.bf16.mxu1 %v1605_v4 }
 0x655   : > { %v924_v22 = vpop.f32.mrb[12].mxu0 }
 0x656   : > { %1029 = vrot.lane.b32.xlu1 %v924_v22, %s1619_s28  ;;  %v1496_v23 = vpop.f32.mrb[13].mxu0 }
 0x657   : > { %v927_v24 = vpop.f32.mrb[14].mxu0 }
 0x658   : > { %v1497_v25 = vpop.f32.mrb[15].mxu0 }
 0x66f   : > { %v875_v28 = vpop.f32.mrb[8].mxu1 }
 0x670   : > { %v1490_v29 = vpop.f32.mrb[9].mxu1 }
 0x671   : > { %v878_v30 = vpop.f32.mrb[10].mxu1 }
 0x672   : > { %v1491_v31 = vpop.f32.mrb[11].mxu1 }
 0x673   : > { %v1022_v21 = vpop.f32.mrb[16].mxu0 }
 0x674   : > { %1037 = vrot.lane.b32.xlu1 %v1022_v21, %s1620_s14  ;;  %v1508_v32 = vpop.f32.mrb[17].mxu0 }
 0x675   : > { %v1025_v33 = vpop.f32.mrb[18].mxu0 }
 0x676   : > { %v1509_v34 = vpop.f32.mrb[19].mxu0 }
 0x677   : > { %v973_v35 = vpop.f32.mrb[12].mxu1 }
 0x678   : > { %1033 = vrot.lane.b32.xlu0 %v973_v35, %s1621_s15  ;;  %v1502_v36 = vpop.f32.mrb[13].mxu1 }
 0x679   : > { %v976_v37 = vpop.f32.mrb[14].mxu1 }
 0x67a   : > { %v1503_v39 = vpop.f32.mrb[15].mxu1 }
 0x6c8   : > { %v1030_v40 = vpop.permute.xlu1 %1029 }
 0x6c9   : > { %v1040_v41 = vsel %vm582_vm5, %v875_v28, %v1030_v40 }
 0x6e6   : > { %v1038_v43 = vpop.permute.xlu1 %1037 }
 0x6ea   : > { %v1034_v42 = vpop.permute.xlu0 %1033 }
 0x6eb   : > { %v1042_v44 = vsel %vm1041_vm8, %v1040_v41, %v1034_v42 }
 0x6ec   : > { %v1044_v45 = vsel %vm1043_vm9, %v1042_v44, %v1038_v43 }
 0x6ed   : > { %v1045_v46 = vpack.c.bf16 %v1044_v45, %v1044_v45 }
 0x6ef   : > { %1515 = vmatmul.mubr.msk.bf16.vlgmr.msra.gmra.mrb[16].mxu1 %vm407_vm0, %v1045_v46 }
 0x6f0   : > { %1534 = vmatprep.mubr.msk.bf16.mxu1 %vm1606_vm1, %v1605_v4  ;;  %1527 = vmatpush3.bf16.msra.mxu1 %v1569_v63 }
 0x6f1   : > { %1528 = vmatprep.subr.bf16.mxu1 %v1605_v4 }
 0x6f4   : > { %1529 = vmatpush3.bf16.msra.mxu1 %v1570_v1 }
 0x6f5   : > { %1530 = vmatprep.subr.bf16.mxu1 %v1605_v4 }
 0x6f8   : > { %1531 = vmatpush3.bf16.msra.mxu1 %v1571_v2 }
 0x6f9   : > { %1532 = vmatprep.subr.bf16.mxu1 %v1605_v4 }
 0x6fc   : > { %1533 = vmatpush3.bf16.msra.mxu1 %v1572_v3 }
 0x7c2   : > { %v1099_v47 = vpop.f32.mrb[16].mxu1 }
 0x7c3   : > { %v1105_v48 = vadd.f32 %v1099_v47, %v1696_v0  ;;  %v1516_v49 = vpop.f32.mrb[17].mxu1 }
 0x7c4   : > { %v1102_v50 = vpop.f32.mrb[18].mxu1 }
 0x7c5   : > { %v1517_v51 = vpop.f32.mrb[19].mxu1  ;;  %v1107_v52 = vmul.f32 %v1105_v48, %v1105_v48 }
 0x7c7   : > { %v1108_v53 = vsel %vm407_vm0, %v1107_v52, 0.0 }
 0x7c8   : > { %1109 = vadd.xlane.f32.xlu0 %v1108_v53 }
 0x855   : > { %v1110_v0 = vpop.xlane.xlu0 %1109 }
 0x856   : > { %v1111_v56 = vmul.f32 0.03125, %v1110_v0 }
 0x858   : > { %v1112_v57 = vadd.f32 1e-05, %v1111_v56 }
 0x85a   : > { %1591 = vrsqrt.f32 %v1112_v57 }
 0x864   : > { %v1592_v58 = vpop.eup %1591 }
 0x865   : > { %v1114_v60 = vmul.f32 %v1592_v58, %v1105_v48 }
 0x867   : > { %v1121_v61 = vmul.f32 %v1412_v59, %v1114_v60 }
 0x869   : > { %v1122_v62 = vpack.c.bf16 %v1121_v61, %v1121_v61 }
 0x86b   : > { %1523 = vmatmul.mubr.msk.bf16.vlgmr.msra.gmra.mrb[20].mxu0 %vm407_vm0, %v1122_v62 }
 0x93e   : > { %v1176_v5 = vpop.f32.mrb[20].mxu0 }
 0x93f   : > { %1190 = vrot.lane.b32.xlu1 %v1176_v5, %s1618_s27  ;;  %v1524_v6 = vpop.f32.mrb[21].mxu0  ;;  %v1416_v4 = vmul.f32 -1.442695, %v1176_v5 }
 0x940   : > { %v1179_v7 = vpop.f32.mrb[22].mxu0 }
 0x941   : > { %v1525_v8 = vpop.f32.mrb[23].mxu0  ;;  %1593 = vpow2.f32 %v1416_v4 }
 0x943   : > { %531 = vrot.lane.b32.xlu1 %v1748_v38, %s1617_s26 }
 0x947   : > { %535 = vrot.lane.b32.xlu1 %v1725_v15, %s1618_s27 }
 0x94b   : > { %v1594_v9 = vpop.eup %1593 }
 0x94c   : > { %v1185_v10 = vadd.f32 1.0, %v1594_v9 }
 0x94e   : > { %1595 = vrcp.f32 %v1185_v10 }
 0x958   : > { %v1596_v11 = vpop.eup %1595 }
 0x959   : > { %v1188_v12 = vmul.f32 %v1596_v11, %v1176_v5 }
 0x9b1   : > { %v1191_v13 = vpop.permute.xlu1 %1190 }
 0x9b2   : > { %v1193_v14 = vmul.f32 %v1191_v13, %v1188_v12 }
 0x9b4   : > { %v1194_v38 = vpack.c.bf16 %v1193_v14, %v1193_v14 }
 0x9b5   : > { %v532_v16 = vpop.permute.xlu1 %531 }
 0x9b6   : > { %534 = vst.msk [vmem:[%s398_s18] sm:$0xff] %vm407_vm0, %v532_v16  ;;  %1535 = vmatmul.mubr.msk.bf16.vlgmr.msra.gmra.mrb[20].mxu1 %vm1227_vm10, %v1194_v38 }
 0x9b9   : > { %v536_v15 = vpop.permute.xlu1 %535 }
 0x9ba   : > { %538 = vst.msk [vmem:[%s402_s20] sm:$0xff] %vm407_vm0, %v536_v15 }
 0xa89   : > { %v1265_v17 = vpop.f32.mrb[20].mxu1 }
 0xa8a   : > { %v1271_v18 = vadd.f32 %v1265_v17, %v1105_v48  ;;  %v1536_v19 = vpop.f32.mrb[21].mxu1 }
 0xa8b   : > { %v1268_v20 = vpop.f32.mrb[22].mxu1 }
 0xa8c   : > { %1272 = vst.msk [vmem:[%s394_s23] sm:$0xff] %vm407_vm0, %v1271_v18  ;;  %v1537_v22 = vpop.f32.mrb[23].mxu1 }
 0xa8d PF: > { %s22_s17 = sadd.s32 1, %s1603_s17  }
 0xa8e   : > { %p19_p4 = scmp.ge.s32.totalorder %s22_s17, 4  }
 0xa90   :  { %21 = sbr.rel (!%p19_p4) target bundleno = 1 (0x1), region = 110 }

</bundles_post_ra>
